<compile_context>
chip_gen: v7x
topology: tpu7x:2x2x1
jax: 0.10.0
libtpu: 0.0.40
codegen_flags: <defaults>
</compile_context>

<pallas_src>
import numpy as np
import jax
import jax.numpy as jnp
from jax.experimental import pallas as pl
from jax.experimental.pallas import tpu as pltpu

K_SIZE = 5
PAD = 2            # P1 = (stride*(1-1) - 1 + dilation*(k_size-1)) // 2 + 1 = 2
C_OUT = 16
POOL = 4
NOISE_SCALE = 0.6


def _quantize(v):
    # sign(.) binarization to {-1, +1}, sign(0) := +1
    return jnp.where(v >= 0.0, 1.0, -1.0).astype(jnp.float32)


def _build_banded_weights(conv1_weight, W):
    """Banded +/-1 weight matrix A, shape (K_SIZE*W, POOL*C_OUT*Wp), bf16.

    A[ky*W + jj, k*(C_OUT*Wp) + c*Wp + jp] = sign(w)[c, ky, jj - j + PAD]   (j = jp*POOL + k)
    when |jj - j| <= PAD, else 0.  Width zero-padding of the conv is implicit (out-of-range
    source columns simply do not appear), and the column permutation groups the pooling
    phase k = j % POOL in the major position so column pooling becomes a max over four
    contiguous 64-lane blocks.
    """
    Wp = W // POOL
    wq = jnp.where(conv1_weight.reshape(C_OUT, K_SIZE, K_SIZE) >= 0.0, 1.0, -1.0)
    wq = wq.astype(jnp.float32)                              # (c, ky, kx)

    jj = np.arange(W)[:, None]                               # source column
    j = np.arange(W)[None, :]                                # output column
    kx = jj - j + PAD                                        # tap index
    valid = (kx >= 0) & (kx < K_SIZE)
    kx_c = np.clip(kx, 0, K_SIZE - 1)

    g = wq[:, :, kx_c]                                       # (C_OUT, K_SIZE, W, W): [c, ky, jj, j]
    g = jnp.where(jnp.asarray(valid)[None, None], g, 0.0)
    a = jnp.transpose(g, (1, 2, 0, 3))                       # (ky, jj, c, j)
    a = a.reshape(K_SIZE * W, C_OUT, Wp, POOL)               # j = jp*POOL + k -> (.., c, jp, k)
    a = jnp.transpose(a, (0, 3, 1, 2)).reshape(K_SIZE * W, POOL * C_OUT * Wp)
    return a.astype(jnp.bfloat16)


def _cnn_noise_kernel(t1_ref, a_ref, x_ref, noise_ref, out_ref, pad_ref):
    Bt, H, W = x_ref.shape
    Hp = H // POOL
    CW = a_ref.shape[1]            # POOL * C_OUT * Wp  (= C_OUT * W)
    CWp = out_ref.shape[1]         # C_OUT * Wp

    t1 = t1_ref[0]

    # binarized_x = output_quantize(x)
    bx = _quantize(x_ref[...])

    # H-padded scratch: zero only the 2-row top/bottom halos, write the interior.
    # (W padding is folded into the banded weight matrix A.)
    pad_ref[:, 0:PAD, :] = jnp.zeros((Bt, PAD, W), jnp.float32)
    pad_ref[:, PAD + H:PAD + H + PAD, :] = jnp.zeros((Bt, PAD, W), jnp.float32)
    pad_ref[:, PAD:PAD + H, :] = bx

    # im2row: 5 sublane-shifted copies concatenated along lanes -> (Bt*H, 5*W).
    rcat = jnp.concatenate(
        [pad_ref[:, ky:ky + H, :].reshape(Bt * H, W) for ky in range(K_SIZE)],
        axis=-1)

    # conv1 as a single MXU matmul against the banded +/-1 weights (exact in bf16, f32 acc).
    conv = jnp.dot(rcat.astype(jnp.bfloat16), a_ref[...],
                   preferred_element_type=jnp.float32)        # (Bt*H, POOL*C_OUT*Wp)

    # conv1post: ReLU -> MaxPool2d(4)
    conv = jnp.maximum(conv, 0.0)
    hmax = jnp.max(conv.reshape(Bt * Hp, POOL, CW), axis=1)   # pool rows (sublane groups)
    vmax = jnp.maximum(                                        # pool cols: 4 contiguous slices
        jnp.maximum(hmax[:, 0 * CWp:1 * CWp], hmax[:, 1 * CWp:2 * CWp]),
        jnp.maximum(hmax[:, 2 * CWp:3 * CWp], hmax[:, 3 * CWp:4 * CWp]))

    # noise add + output quantize(. - thresh1)
    out_ref[...] = _quantize(vmax + NOISE_SCALE * noise_ref[...] - t1)


def cnn_noise_forward(x_nchw, conv1_weight, thresh1, noise_nchw, *, bt=None):
    B, Cin, H, W = x_nchw.shape
    assert Cin == 1 and H % POOL == 0 and W % POOL == 0 and C_OUT == 16
    Hp, Wp = H // POOL, W // POOL

    if bt is None:
        bt = min(8, B)
    nb = -(-B // bt)                       # number of grid steps
    Bpad = nb * bt
    assert nb == 1 or (bt * Hp) % 8 == 0   # keep output block sublane-aligned

    x = x_nchw[:, 0].astype(jnp.float32)                                   # (B, H, W)
    nz = jnp.transpose(noise_nchw.astype(jnp.float32), (0, 2, 1, 3))       # (B, Hp, C, Wp)
    nz = nz.reshape(B * Hp, C_OUT * Wp)
    if Bpad != B:
        x = jnp.concatenate([x, jnp.zeros((Bpad - B, H, W), jnp.float32)], axis=0)
        nz = jnp.concatenate(
            [nz, jnp.zeros(((Bpad - B) * Hp, C_OUT * Wp), jnp.float32)], axis=0)

    a = _build_banded_weights(conv1_weight, W)                             # (5*W, 4*C_OUT*Wp)

    pooled_q = pl.pallas_call(
        _cnn_noise_kernel,
        out_shape=jax.ShapeDtypeStruct((Bpad * Hp, C_OUT * Wp), jnp.float32),
        grid_spec=pltpu.PrefetchScalarGridSpec(
            num_scalar_prefetch=0,
            grid=(nb,),
            in_specs=[
                pl.BlockSpec(memory_space=pltpu.MemorySpace.SMEM),                  # thresh1
                pl.BlockSpec((K_SIZE * W, POOL * C_OUT * Wp), lambda gb: (0, 0)),   # banded weights
                pl.BlockSpec((bt, H, W), lambda gb: (gb, 0, 0)),                    # x
                pl.BlockSpec((bt * Hp, C_OUT * Wp), lambda gb: (gb, 0)),            # noise
            ],
            out_specs=pl.BlockSpec((bt * Hp, C_OUT * Wp), lambda gb: (gb, 0)),
            scratch_shapes=[pltpu.VMEM((bt, H + 2 * PAD, W), jnp.float32)],
        ),
        compiler_params=pltpu.CompilerParams(dimension_semantics=("parallel",)),
    )(thresh1.astype(jnp.float32), a, x, nz)

    # train_utils.scamp_shape (pure layout glue): channel c = 4*g + r goes to
    # block-row r (height) and block-col g (width) of the (4*Hp, 4*Wp) canvas.
    q = pooled_q[:B * Hp].reshape(B, Hp, 4, 4, Wp)                         # (b, ip, g, r, jp)
    out = jnp.transpose(q, (0, 3, 1, 2, 4)).reshape(B, 1, 4 * Hp, 4 * Wp)
    return out


def reference_forward(x_nchw, conv1_weight, thresh1, noise_nchw):
    """Pure-JAX reference mirroring the PyTorch forward."""
    t1 = thresh1[0]
    bx = jnp.where(x_nchw >= 0.0, 1.0, -1.0).astype(jnp.float32)
    wq = jnp.where(conv1_weight >= 0.0, 1.0, -1.0).astype(jnp.float32)
    conv = jax.lax.conv_general_dilated(
        bx, wq, window_strides=(1, 1), padding=((PAD, PAD), (PAD, PAD)),
        dimension_numbers=("NCHW", "OIHW", "NCHW"))
    relu = jnp.maximum(conv, 0.0)
    B, C, H, W = relu.shape
    pooled = relu.reshape(B, C, H // POOL, POOL, W // POOL, POOL).max(axis=(3, 5))
    q = jnp.where(pooled + NOISE_SCALE * noise_nchw - t1 >= 0.0, 1.0, -1.0)
    # scamp_shape, mirroring torch's row1..row4 / cat construction exactly
    rows = [jnp.concatenate([q[:, 4 * g + r:4 * g + r + 1] for r in range(4)], axis=2)
            for g in range(4)]
    return jnp.concatenate(rows, axis=3)


if __name__ == "__main__":
    key = jax.random.PRNGKey(0)
    kx_, kw_, kn_ = jax.random.split(key, 3)
    B, H, W = 2, 16, 16

    x = jax.random.normal(kx_, (B, 1, H, W), dtype=jnp.float32)
    conv1_weight = jax.random.normal(kw_, (C_OUT, 1, K_SIZE, K_SIZE), dtype=jnp.float32)
    noise = jax.random.normal(kn_, (B, C_OUT, H // POOL, W // POOL), dtype=jnp.float32)
    thresh1 = jnp.ones((1,), jnp.float32)   # nn.Parameter(torch.ones(1))

    out = cnn_noise_forward(x, conv1_weight, thresh1, noise)
    out = jax.block_until_ready(out)

    ref = reference_forward(x, conv1_weight, thresh1, noise)
    np.testing.assert_allclose(np.asarray(out), np.asarray(ref), atol=1e-5)
    assert out.shape == (B, 1, H, W)
    print("KERNEL_OK")
</pallas_src>

<mosaic_0001>
module attributes {stable_mosaic.version = 11 : i64} {
  func.func @_cnn_noise_kernel(%arg0: i32, %arg1: memref<1xf32, #tpu.memory_space<smem>>, %arg2: memref<80x256xbf16, #tpu.memory_space<vmem>>, %arg3: memref<2x16x16xf32, #tpu.memory_space<vmem>>, %arg4: memref<8x64xf32, #tpu.memory_space<vmem>>, %arg5: memref<8x64xf32, #tpu.memory_space<vmem>>, %arg6: memref<2x20x16xf32, #tpu.memory_space<vmem>>) attributes {dimension_semantics = [#tpu.dimension_semantics<parallel>], iteration_bounds = array<i64: 1>, scalar_prefetch = 0 : i64, scratch_operands = 1 : i64, tpu.core_type = #tpu.core_type<tc>, window_params = [{transform_indices = @transform_0, window_bounds = array<i64: 1>}, {pipeline_mode = #tpu.pipeline_mode<synchronous>, transform_indices = @transform_1, window_bounds = array<i64: 80, 256>}, {transform_indices = @transform_2, window_bounds = array<i64: 2, 16, 16>}, {transform_indices = @transform_3, window_bounds = array<i64: 8, 64>}, {transform_indices = @transform_4, window_bounds = array<i64: 8, 64>}]} {
    %c0 = arith.constant 0 : index
    %0 = memref.load %arg1[%c0] : memref<1xf32, #tpu.memory_space<smem>>
    %c0_0 = arith.constant 0 : index
    %c0_1 = arith.constant 0 : index
    %c0_2 = arith.constant 0 : index
    %1 = vector.load %arg3[%c0_0, %c0_1, %c0_2] : memref<2x16x16xf32, #tpu.memory_space<vmem>>, vector<2x16x16xf32>
    %cst = arith.constant 0.000000e+00 : f32
    %2 = vector.broadcast %cst : f32 to vector<2x16x16xf32>
    %3 = arith.cmpf oge, %1, %2 : vector<2x16x16xf32>
    %cst_3 = arith.constant 1.000000e+00 : f32
    %cst_4 = arith.constant -1.000000e+00 : f32
    %4 = vector.broadcast %cst_3 : f32 to vector<2x16x16xf32>
    %5 = vector.broadcast %cst_4 : f32 to vector<2x16x16xf32>
    %6 = arith.select %3, %4, %5 : vector<2x16x16xi1>, vector<2x16x16xf32>
    %cst_5 = arith.constant 0.000000e+00 : f32
    %7 = vector.broadcast %cst_5 : f32 to vector<2x2x16xf32>
    %c0_6 = arith.constant 0 : index
    %c0_7 = arith.constant 0 : index
    %c0_8 = arith.constant 0 : index
    %8 = vector.load %arg6[%c0_6, %c0_7, %c0_8] : memref<2x20x16xf32, #tpu.memory_space<vmem>>, vector<2x2x16xf32>
    tpu.vector_store %arg6[%c0_6, %c0_7, %c0_8], %7 {strides = array<i32>} : memref<2x20x16xf32, #tpu.memory_space<vmem>>, vector<2x2x16xf32>,
    %cst_9 = arith.constant 0.000000e+00 : f32
    %9 = vector.broadcast %cst_9 : f32 to vector<2x2x16xf32>
    %c0_10 = arith.constant 0 : index
    %c18 = arith.constant 18 : index
    %c0_11 = arith.constant 0 : index
    %10 = vector.load %arg6[%c0_10, %c18, %c0_11] : memref<2x20x16xf32, #tpu.memory_space<vmem>>, vector<2x2x16xf32>
    tpu.vector_store %arg6[%c0_10, %c18, %c0_11], %9 {strides = array<i32>} : memref<2x20x16xf32, #tpu.memory_space<vmem>>, vector<2x2x16xf32>,
    %c0_12 = arith.constant 0 : index
    %c2 = arith.constant 2 : index
    %c0_13 = arith.constant 0 : index
    %11 = vector.load %arg6[%c0_12, %c2, %c0_13] : memref<2x20x16xf32, #tpu.memory_space<vmem>>, vector<2x16x16xf32>
    tpu.vector_store %arg6[%c0_12, %c2, %c0_13], %6 {strides = array<i32>} : memref<2x20x16xf32, #tpu.memory_space<vmem>>, vector<2x16x16xf32>,
    %c0_14 = arith.constant 0 : index
    %c0_15 = arith.constant 0 : index
    %c0_16 = arith.constant 0 : index
    %12 = vector.load %arg6[%c0_14, %c0_15, %c0_16] : memref<2x20x16xf32, #tpu.memory_space<vmem>>, vector<2x16x16xf32>
    %13 = vector.shape_cast %12 : vector<2x16x16xf32> to vector<32x16xf32>
    %c0_17 = arith.constant 0 : index
    %c1 = arith.constant 1 : index
    %c0_18 = arith.constant 0 : index
    %14 = vector.load %arg6[%c0_17, %c1, %c0_18] : memref<2x20x16xf32, #tpu.memory_space<vmem>>, vector<2x16x16xf32>
    %15 = vector.shape_cast %14 : vector<2x16x16xf32> to vector<32x16xf32>
    %c0_19 = arith.constant 0 : index
    %c2_20 = arith.constant 2 : index
    %c0_21 = arith.constant 0 : index
    %16 = vector.load %arg6[%c0_19, %c2_20, %c0_21] : memref<2x20x16xf32, #tpu.memory_space<vmem>>, vector<2x16x16xf32>
    %17 = vector.shape_cast %16 : vector<2x16x16xf32> to vector<32x16xf32>
    %c0_22 = arith.constant 0 : index
    %c3 = arith.constant 3 : index
    %c0_23 = arith.constant 0 : index
    %18 = vector.load %arg6[%c0_22, %c3, %c0_23] : memref<2x20x16xf32, #tpu.memory_space<vmem>>, vector<2x16x16xf32>
    %19 = vector.shape_cast %18 : vector<2x16x16xf32> to vector<32x16xf32>
    %c0_24 = arith.constant 0 : index
    %c4 = arith.constant 4 : index
    %c0_25 = arith.constant 0 : index
    %20 = vector.load %arg6[%c0_24, %c4, %c0_25] : memref<2x20x16xf32, #tpu.memory_space<vmem>>, vector<2x16x16xf32>
    %21 = vector.shape_cast %20 : vector<2x16x16xf32> to vector<32x16xf32>
    %22 = tpu.concatenate %13, %15, %17, %19, %21 in 1 : vector<32x16xf32>, vector<32x16xf32>, vector<32x16xf32>, vector<32x16xf32>, vector<32x16xf32> -> vector<32x80xf32>
    %23 = arith.truncf %22 : vector<32x80xf32> to vector<32x80xbf16>
    %c0_26 = arith.constant 0 : index
    %c0_27 = arith.constant 0 : index
    %24 = vector.load %arg2[%c0_26, %c0_27] : memref<80x256xbf16, #tpu.memory_space<vmem>>, vector<80x256xbf16>
    %cst_28 = arith.constant dense<0.000000e+00> : vector<32x256xf32>
    %25 = tpu.matmul %23, %24, %cst_28 {dimension_numbers = #tpu.dot_dimension_numbers<[1], [0], [0], [1], [0, 0, 1, 1], [], []>} : vector<32x80xbf16>, vector<80x256xbf16>, vector<32x256xf32> -> vector<32x256xf32>
    %cst_29 = arith.constant 0.000000e+00 : f32
    %26 = vector.broadcast %cst_29 : f32 to vector<32x256xf32>
    %27 = arith.maximumf %25, %26 : vector<32x256xf32>
    %28 = vector.shape_cast %27 : vector<32x256xf32> to vector<8x4x256xf32>
    %cst_30 = arith.constant dense<0xFF800000> : vector<8x256xf32>
    %29 = vector.multi_reduction <maximumf>, %28, %cst_30 [1] : vector<8x4x256xf32> to vector<8x256xf32>
    %30 = vector.extract_strided_slice %29 {offsets = [0, 0], sizes = [8, 64], strides = [1, 1]} : vector<8x256xf32> to vector<8x64xf32>
    %31 = vector.extract_strided_slice %29 {offsets = [0, 64], sizes = [8, 64], strides = [1, 1]} : vector<8x256xf32> to vector<8x64xf32>
    %32 = arith.maximumf %30, %31 : vector<8x64xf32>
    %33 = vector.extract_strided_slice %29 {offsets = [0, 128], sizes = [8, 64], strides = [1, 1]} : vector<8x256xf32> to vector<8x64xf32>
    %34 = vector.extract_strided_slice %29 {offsets = [0, 192], sizes = [8, 64], strides = [1, 1]} : vector<8x256xf32> to vector<8x64xf32>
    %35 = arith.maximumf %33, %34 : vector<8x64xf32>
    %36 = arith.maximumf %32, %35 : vector<8x64xf32>
    %c0_31 = arith.constant 0 : index
    %c0_32 = arith.constant 0 : index
    %37 = vector.load %arg4[%c0_31, %c0_32] : memref<8x64xf32, #tpu.memory_space<vmem>>, vector<8x64xf32>
    %cst_33 = arith.constant 6.000000e-01 : f32
    %38 = vector.broadcast %cst_33 : f32 to vector<8x64xf32>
    %39 = arith.mulf %38, %37 : vector<8x64xf32>
    %40 = arith.addf %36, %39 : vector<8x64xf32>
    %41 = vector.broadcast %0 : f32 to vector<8x64xf32>
    %42 = arith.subf %40, %41 : vector<8x64xf32>
    %cst_34 = arith.constant 0.000000e+00 : f32
    %43 = vector.broadcast %cst_34 : f32 to vector<8x64xf32>
    %44 = arith.cmpf oge, %42, %43 : vector<8x64xf32>
    %cst_35 = arith.constant 1.000000e+00 : f32
    %cst_36 = arith.constant -1.000000e+00 : f32
    %45 = vector.broadcast %cst_35 : f32 to vector<8x64xf32>
    %46 = vector.broadcast %cst_36 : f32 to vector<8x64xf32>
    %47 = arith.select %44, %45, %46 : vector<8x64xi1>, vector<8x64xf32>
    %c0_37 = arith.constant 0 : index
    %c0_38 = arith.constant 0 : index
    %48 = vector.load %arg5[%c0_37, %c0_38] : memref<8x64xf32, #tpu.memory_space<vmem>>, vector<8x64xf32>
    tpu.vector_store %arg5[%c0_37, %c0_38], %47 {strides = array<i32>} : memref<8x64xf32, #tpu.memory_space<vmem>>, vector<8x64xf32>,
    return
  }
  func.func @transform_0(%arg0: i32) -> i32 {
    %c0_i32 = arith.constant 0 : i32
    %c0_i32_0 = arith.constant 0 : i32
    return %c0_i32 : i32
  }
  func.func @transform_1(%arg0: i32) -> (i32, i32) {
    %c0_i32 = arith.constant 0 : i32
    %c0_i32_0 = arith.constant 0 : i32
    %c0_i32_1 = arith.constant 0 : i32
    return %c0_i32, %c0_i32_0 : i32, i32
  }
  func.func @transform_2(%arg0: i32) -> (i32, i32, i32) {
    %c0_i32 = arith.constant 0 : i32
    %c0_i32_0 = arith.constant 0 : i32
    %c0_i32_1 = arith.constant 0 : i32
    return %arg0, %c0_i32, %c0_i32_0 : i32, i32, i32
  }
  func.func @transform_3(%arg0: i32) -> (i32, i32) {
    %c0_i32 = arith.constant 0 : i32
    %c0_i32_0 = arith.constant 0 : i32
    return %arg0, %c0_i32 : i32, i32
  }
  func.func @transform_4(%arg0: i32) -> (i32, i32) {
    %c0_i32 = arith.constant 0 : i32
    %c0_i32_0 = arith.constant 0 : i32
    return %arg0, %c0_i32 : i32, i32
  }
}

</mosaic_0001>

<bundles_post_ra>
// kernel: tpu_custom_call.1
= control target key start
LH: loop header
LB: loop body
LE: loop exit
PB: predicated region body
PF: predicated region fallthrough
CT: control target
= control target key end

     0   :  { %10 = vsyncpa [#allocation5], 0  ;;  %s1070_s0 = inlined_call_operand.<no memory space> [shape: f32[1], index: 0, kind: input, shape index: {}]   ;;  %s1071_s1 = inlined_call_operand.hbm [shape: bf16[80,256], index: 1, kind: input, shape index: {}]   ;;  %s1072_s2 = inlined_call_operand.hbm [shape: f32[2,16,16], index: 2, kind: input, shape index: {}]   ;;  %s1073_s3 = inlined_call_operand.vmem [shape: f32[8,64], index: 3, kind: input, shape index: {}]   ;;  %s1074_s4 = inlined_call_operand.hbm [shape: f32[8,64], index: 4, kind: output, shape index: {}]  }
   0x1   :  { %11 = vsyncpa [#allocation8], 0 }
   0x2   :  { %12 = vsyncpa [#allocation6], 0  ;;  %s812_s15 = smov [#allocation4]   ;;  %s740_s19 = scalar_lea.hbm %s1071_s1, 1280 }
   0x3   :  { %s20_s16 = sshll.u32 %s812_s15, 4  ;;  %p741_p0 = scmp.ne.s32.totalorder %s1071_s1, %s740_s19  ;;  %s21_s16 = int_to_ptr.vmem [resolvable:$true] %s20_s16 }
   0x4   :  { %p744_p1 = scmp.lt.u32.totalorder %s740_s19, %s1071_s1 }
   0x6   :  { %p746_p2 = pnand %p744_p1, %p741_p0 }
   0x8   :  { %749 = shalt.err (!%p746_p2)
}
   0x9   :  { %s750_s24 = scalar_lea.vmem %s21_s16, 1280  ;;  %p755_p4 = scmp.lt.s32.totalorder %s21_s16, %s21_s16 }
   0xa   :  { %p751_p3 = scmp.ne.s32.totalorder %s21_s16, %s750_s24  ;;  %p756_p5 = scmp.lt.s32.totalorder %s750_s24, %s750_s24 }
   0xc   :  { %p757_p6 = por %p756_p5, %p755_p4 }
   0xe   :  { %p758_p7 = pnand %p757_p6, %p751_p3 }
  0x10   :  { %761 = shalt.err (!%p758_p7)
}
  0x11   :  { %s813_s25 = smov 128   ;;  %s814_s26 = smov 8  }
  0x12   :  { %26 = dma.hbm_to_vmem [thread:$0]  %s1071_s1, 1280, %s21_s16, [#allocation5], %s813_s25, %s813_s25, %s814_s26  }
  0x13   :  { %s815_s29 = smov [#allocation7]   ;;  %s762_s7 = scalar_lea.hbm %s1072_s2, 512 }
  0x14   :  { %s32_s30 = sshll.u32 %s815_s29, 4  ;;  %p763_p8 = scmp.ne.s32.totalorder %s1072_s2, %s762_s7  ;;  %s33_s30 = int_to_ptr.vmem [resolvable:$true] %s32_s30 }
  0x15   :  { %p766_p9 = scmp.lt.u32.totalorder %s762_s7, %s1072_s2 }
  0x17   :  { %p768_p10 = pnand %p766_p9, %p763_p8 }
  0x19   :  { %771 = shalt.err (!%p768_p10)
}
  0x1a   :  { %s772_s12 = scalar_lea.vmem %s33_s30, 512  ;;  %p777_p12 = scmp.lt.s32.totalorder %s33_s30, %s33_s30 }
  0x1b   :  { %p773_p11 = scmp.ne.s32.totalorder %s33_s30, %s772_s12  ;;  %p778_p13 = scmp.lt.s32.totalorder %s772_s12, %s772_s12 }
  0x1d   :  { %p779_p0 = por %p778_p13, %p777_p12 }
  0x1f   :  { %p780_p1 = pnand %p779_p0, %p773_p11 }
  0x21   :  { %783 = shalt.err (!%p780_p1)
}
  0x22   :  { %38 = dma.hbm_to_vmem [thread:$0]  %s1072_s2, 512, %s33_s30, [#allocation8], %s813_s25, %s813_s25, %s814_s26  }
  0x23   :  { %806 = dma.done.wait [#allocation5], 1280  }
  0x24   :  { %807 = vsyncadd [#allocation5], 4294966016 }
  0x25   :  { %808 = dma.done.wait [#allocation8], 512  }
  0x26   :  { %809 = vsyncadd [#allocation8], 4294966784  ;;  %vm61_vm0 = vcmask 123904   ;;  %v816_v0 = vmov 0.0   ;;  %v49_v1 = vld [vmem:[#allocation7] sm:$0xff]  ;;  %v50_v2 = vld [vmem:[#allocation7 + $0x8] sm:$0xff] }
  0x27   :  { %62 = vst.msk [vmem:[#allocation2] sm:$0x3] %vm61_vm0, %v816_v0  ;;  %63 = vst.msk [vmem:[#allocation2 + $0x18] sm:$0x3] %vm61_vm0, %v816_v0  ;;  %vm66_vm1 = vcmask 130048   ;;  %v51_v3 = vld [vmem:[#allocation7 + $0x10] sm:$0xff] }
  0x28   :  { %64 = vst.msk [vmem:[#allocation2 + $0x12] sm:$0x3] %vm61_vm0, %v816_v0  ;;  %65 = vst.msk [vmem:[#allocation2 + $0x2a] sm:$0x3] %vm61_vm0, %v816_v0  ;;  %vm53_vm2 = vcmp.ge.f32.partialorder %v49_v1, 0.0  ;;  %vm54_vm3 = vcmp.ge.f32.partialorder %v50_v2, 0.0 }
  0x29   :  { %v52_v4 = vld [vmem:[#allocation7 + $0x18] sm:$0xff]  ;;  %vm55_vm4 = vcmp.ge.f32.partialorder %v51_v3, 0.0  ;;  %v817_v5 = vmov -1.0   ;;  %v728_v12 = vld [vmem:[#allocation4 + $0x14] ss:$8 sps:$4 sm:$0xff]   ;;  %v818_v24 = vmov 0  }
  0x2a   :  { %v57_v6 = vsel %vm53_vm2, 1.0, %v817_v5  ;;  %v58_v7 = vsel %vm54_vm3, 1.0, %v817_v5  ;;  %vm56_vm5 = vcmp.ge.f32.partialorder %v52_v4, 0.0  ;;  %v59_v8 = vsel %vm55_vm4, 1.0, %v817_v5  ;;  %v725_v9 = vld [vmem:[#allocation4 + $0x4] ss:$8 sps:$4 sm:$0xff]   ;;  %275 = vmatprep.mubr.bf16.mxu0 %v818_v24  ;;  %285 = vmatprep.mubr.bf16.mxu1 %v818_v24 }
  0x2b   :  { %67 = vst.msk [vmem:[#allocation2 + $0x2] sm:$0xff] %vm66_vm1, %v57_v6  ;;  %68 = vst.msk [vmem:[#allocation2 + $0xa] sm:$0xff] %vm66_vm1, %v58_v7  ;;  %v60_v10 = vsel %vm56_vm5, 1.0, %v817_v5  ;;  %v727_v11 = vld [vmem:[#allocation4] ss:$8 sps:$4 sm:$0xff]   ;;  %243 = vmatprep.subr.bf16.mxu0 %v725_v9  ;;  %663 = vmatprep.subr.bf16.mxu1 %v725_v9  ;;  %s819_s2 = smov 16  }
  0x2c   :  { %69 = vst.msk [vmem:[#allocation2 + $0x1a] sm:$0xff] %vm66_vm1, %v59_v8  ;;  %70 = vst.msk [vmem:[#allocation2 + $0x22] sm:$0xff] %vm66_vm1, %v60_v10  ;;  %244 = vmatpush1.bf16.msra.mxu0 %v727_v11  ;;  %v730_v13 = vld [vmem:[#allocation4 + $0x10] ss:$8 sps:$4 sm:$0xff]   ;;  %668 = vmatpush1.bf16.msra.mxu1 %v727_v11  ;;  %v731_v14 = vld [vmem:[#allocation4 + $0x24] ss:$8 sps:$4 sm:$0xff]  }
  0x2d   :  { %245 = vmatprep.subr.bf16.mxu0 %v728_v12  ;;  %664 = vmatprep.subr.bf16.mxu1 %v728_v12  ;;  %v733_v15 = vld [vmem:[#allocation4 + $0x20] ss:$8 sps:$4 sm:$0xff]   ;;  %v734_v16 = vld [vmem:[#allocation4 + $0x34] ss:$8 sps:$4 sm:$0xff]   ;;  %v736_v29 = vld [vmem:[#allocation4 + $0x30] ss:$8 sps:$4 sm:$0xff]  }
  0x2e   :  { %s820_s14 = smov 48   ;;  %v737_v33 = vld [vmem:[#allocation4 + $0x44] ss:$8 sps:$4 sm:$0xff]   ;;  %s821_s15 = smov 32   ;;  %v739_v37 = vld [vmem:[#allocation4 + $0x40] ss:$8 sps:$4 sm:$0xff]  }
  0x2f   :  { %s822_s16 = smov 64   ;;  %vm159_vm6 = vcmask 261120   ;;  %vm164_vm7 = vcmask 392192   ;;  %vm169_vm8 = vcmask 523264   ;;  %vm236_vm9 = vcmask 654336  }
  0x30   :  { %246 = vmatpush1.bf16.msra.mxu0 %v730_v13  ;;  %669 = vmatpush1.bf16.msra.mxu1 %v730_v13  ;;  %vm344_vm10 = vcmask 1043456   ;;  %vm605_vm14 = vcmask 1041409   ;;  %vm608_vm15 = vcmask 1042434   ;;  %vm611_vm3 = vcmask 1043459  }
  0x31   :  { %247 = vmatprep.subr.bf16.mxu0 %v731_v14  ;;  %665 = vmatprep.subr.bf16.mxu1 %v731_v14  ;;  %vm614_vm4 = vcmask 1044484  }
  0x32   :  { %v75_v17 = vld [vmem:[#allocation2 + $0x1] sm:$0xff]  ;;  %v76_v18 = vld [vmem:[#allocation2 + $0x9] sm:$0xff] }
  0x33   :  { %v83_v19 = vld [vmem:[#allocation2 + $0x3] sm:$0xff]  ;;  %v685_v20 = vpack.i.bf16 %v76_v18, %v75_v17  ;;  %v84_v21 = vld [vmem:[#allocation2 + $0xb] sm:$0xff]  ;;  %v77_v31 = vld [vmem:[#allocation2 + $0x19] sm:$0xff] }
  0x34   :  { %v79_v22 = vld [vmem:[#allocation2 + $0x2] sm:$0xff]  ;;  %v80_v23 = vld [vmem:[#allocation2 + $0xa] sm:$0xff]  ;;  %v695_v25 = vpack.i.bf16 %v84_v21, %v83_v19  ;;  %248 = vmatpush1.bf16.msra.mxu0 %v733_v15  ;;  %v81_v34 = vld [vmem:[#allocation2 + $0x1a] sm:$0xff]  ;;  %670 = vmatpush1.bf16.msra.mxu1 %v733_v15 }
  0x35   :  { %v87_v26 = vld [vmem:[#allocation2 + $0x4] sm:$0xff]  ;;  %v88_v27 = vld [vmem:[#allocation2 + $0xc] sm:$0xff]  ;;  %686 = vrot.lane.b32.xlu0 %v685_v20, %s819_s2  ;;  %v690_v28 = vpack.i.bf16 %v80_v23, %v79_v22  ;;  %249 = vmatprep.subr.bf16.mxu0 %v734_v16  ;;  %v85_v39 = vld [vmem:[#allocation2 + $0x1b] sm:$0xff] }
  0x36   :  { %696 = vrot.lane.b32.xlu1 %v695_v25, %s820_s14  ;;  %v700_v30 = vpack.i.bf16 %v88_v27, %v87_v26  ;;  %v78_v32 = vld [vmem:[#allocation2 + $0x21] sm:$0xff]  ;;  %666 = vmatprep.subr.bf16.mxu1 %v734_v16  ;;  %v73_v1 = vld [vmem:[#allocation2 + $0x18] sm:$0xff] }
  0x37   :  { %v82_v35 = vld [vmem:[#allocation2 + $0x22] sm:$0xff]  ;;  %v705_v36 = vpack.i.bf16 %v78_v32, %v77_v31 }
  0x38   :  { %250 = vmatpush1.bf16.msra.mxu0 %v736_v29  ;;  %v710_v38 = vpack.i.bf16 %v82_v35, %v81_v34  ;;  %v86_v40 = vld [vmem:[#allocation2 + $0x23] sm:$0xff]  ;;  %671 = vmatpush1.bf16.msra.mxu1 %v736_v29 }
  0x39   :  { %691 = vrot.lane.b32.xlu0 %v690_v28, %s821_s15  ;;  %251 = vmatprep.subr.bf16.mxu0 %v737_v33  ;;  %v89_v41 = vld [vmem:[#allocation2 + $0x1c] sm:$0xff]  ;;  %v90_v42 = vld [vmem:[#allocation2 + $0x24] sm:$0xff]  ;;  %v715_v43 = vpack.i.bf16 %v86_v40, %v85_v39 }
  0x3a   :  { %701 = vrot.lane.b32.xlu1 %v700_v30, %s822_s16  ;;  %667 = vmatprep.subr.bf16.mxu1 %v737_v33  ;;  %v720_v44 = vpack.i.bf16 %v90_v42, %v89_v41  ;;  %v71_v49 = vld [vmem:[#allocation2] sm:$0xff]  ;;  %v72_v50 = vld [vmem:[#allocation2 + $0x8] sm:$0xff] }
  0x3b   :  { %v74_v2 = vld [vmem:[#allocation2 + $0x20] sm:$0xff] }
  0x3c   :  { %252 = vmatpush1.bf16.msra.mxu0 %v739_v37  ;;  %672 = vmatpush1.bf16.msra.mxu1 %v739_v37 }
  0x3d   :  { %706 = vrot.lane.b32.xlu0 %v705_v36, %s819_s2 }
  0x3e   :  { %711 = vrot.lane.b32.xlu1 %v710_v38, %s821_s15 }
  0x41   :  { %716 = vrot.lane.b32.xlu0 %v715_v43, %s820_s14 }
  0x42   :  { %721 = vrot.lane.b32.xlu1 %v720_v44, %s822_s16 }
  0xa7   :  { %v687_v45 = vpop.permute.xlu0 %686 }
  0xa8   :  { %v697_v46 = vpop.permute.xlu1 %696  ;;  %v689_v47 = vunpack.i.h.bf16 %v687_v45  ;;  %v688_v48 = vunpack.i.l.bf16 %v687_v45 }
  0xa9   :  { %v699_v52 = vunpack.i.h.bf16 %v697_v46  ;;  %v698_v53 = vunpack.i.l.bf16 %v697_v46 }
  0xaa   :  { %v155_v57 = vsel %vm66_vm1, %v71_v49, %v688_v48  ;;  %v156_v58 = vsel %vm66_vm1, %v72_v50, %v689_v47 }
  0xab   :  { %v692_v51 = vpop.permute.xlu0 %691 }
  0xac   :  { %v694_v54 = vunpack.i.h.bf16 %v692_v51  ;;  %v693_v55 = vunpack.i.l.bf16 %v692_v51  ;;  %v702_v56 = vpop.permute.xlu1 %701 }
  0xad   :  { %v704_v59 = vunpack.i.h.bf16 %v702_v56  ;;  %v703_v60 = vunpack.i.l.bf16 %v702_v56 }
  0xae   :  { %v160_v61 = vsel %vm159_vm6, %v155_v57, %v693_v55  ;;  %v161_v62 = vsel %vm159_vm6, %v156_v58, %v694_v54 }
  0xaf   :  { %v165_v63 = vsel %vm164_vm7, %v160_v61, %v698_v53  ;;  %v166_v0 = vsel %vm164_vm7, %v161_v62, %v699_v52  ;;  %v707_v3 = vpop.permute.xlu0 %706 }
  0xb0   :  { %v170_v4 = vsel %vm169_vm8, %v165_v63, %v703_v60  ;;  %v171_v6 = vsel %vm169_vm8, %v166_v0, %v704_v59  ;;  %v709_v7 = vunpack.i.h.bf16 %v707_v3  ;;  %v708_v8 = vunpack.i.l.bf16 %v707_v3  ;;  %v712_v9 = vpop.permute.xlu1 %711 }
  0xb1   :  { %v174_v10 = vpack.c.bf16 %v171_v6, %v170_v4  ;;  %v714_v11 = vunpack.i.h.bf16 %v712_v9  ;;  %v713_v12 = vunpack.i.l.bf16 %v712_v9 }
  0xb2   :  { %v158_v13 = vsel %vm66_vm1, %v74_v2, %v709_v7  ;;  %v157_v14 = vsel %vm66_vm1, %v73_v1, %v708_v8 }
  0xb3   :  { %v717_v15 = vpop.permute.xlu0 %716  ;;  %653 = vmatmul.mubr.msk.bf16.vlgmr.msra.gmra.mrb[0].mxu0 %vm236_vm9, %v174_v10  ;;  %v162_v19 = vsel %vm159_vm6, %v157_v14, %v713_v12  ;;  %v163_v20 = vsel %vm159_vm6, %v158_v13, %v714_v11  ;;  %vm617_vm6 = vcmask 1045509  }
  0xb4   :  { %v719_v16 = vunpack.i.h.bf16 %v717_v15  ;;  %v718_v17 = vunpack.i.l.bf16 %v717_v15  ;;  %v722_v18 = vpop.permute.xlu1 %721 }
  0xb5   :  { %v724_v21 = vunpack.i.h.bf16 %v722_v18  ;;  %v723_v22 = vunpack.i.l.bf16 %v722_v18 }
  0xb6   :  { %v167_v23 = vsel %vm164_vm7, %v162_v19, %v718_v17  ;;  %v168_v24 = vsel %vm164_vm7, %v163_v20, %v719_v16 }
  0xb7   :  { %v172_v25 = vsel %vm169_vm8, %v167_v23, %v723_v22  ;;  %v173_v26 = vsel %vm169_vm8, %v168_v24, %v724_v21 }
  0xb8   :  { %v175_v27 = vpack.c.bf16 %v173_v26, %v172_v25 }
  0xba   :  { %654 = vmatmul.mubr.msk.bf16.vlgmr.msra.gmra.mrb[0].mxu1 %vm236_vm9, %v175_v27  ;;  %vm620_vm9 = vcmask 1046534  }
 0x186   :  { %v277_v28 = vpop.f32.mrb[0].mxu0 }
 0x187   :  { %v296_v29 = vmax.f32 %v277_v28, 0.0  ;;  %v279_v30 = vpop.f32.mrb[1].mxu0 }
 0x188   :  { %v297_v31 = vmax.f32 %v279_v30, 0.0  ;;  %v281_v32 = vpop.f32.mrb[2].mxu0 }
 0x189   :  { %v298_v33 = vmax.f32 %v281_v32, 0.0  ;;  %v283_v34 = vpop.f32.mrb[3].mxu0 }
 0x18a   :  { %v312_v35 = vcombine.low %v296_v29, %v297_v31  ;;  %v313_v36 = vcombine.high %v296_v29, %v297_v31  ;;  %v655_v37 = vcombine.low %v297_v31, %v297_v31  ;;  %v656_v38 = vcombine.high %v297_v31, %v297_v31 }
 0x18b   :  { %v905_v39 = vmax.f32 %v283_v34, 0.0 }
 0x18c   :  { %v366_v40 = vsel %vm344_vm10, %v656_v38, -inf  ;;  %v359_v41 = vsel %vm344_vm10, %v313_v36, -inf  ;;  %v345_v42 = vsel %vm344_vm10, %v312_v35, -inf  ;;  %v352_v43 = vsel %vm344_vm10, %v655_v37, -inf }
 0x18d   :  { %v314_v44 = vcombine.low %v298_v33, %v905_v39  ;;  %v315_v45 = vcombine.high %v298_v33, %v905_v39  ;;  %v657_v46 = vcombine.low %v905_v39, %v905_v39  ;;  %v287_v47 = vpop.f32.mrb[0].mxu1  ;;  %v367_v50 = vrot.slane %v366_v40, 4 }
 0x18e   :  { %v300_v48 = vmax.f32 %v287_v47, 0.0  ;;  %v289_v49 = vpop.f32.mrb[1].mxu1  ;;  %v360_v51 = vrot.slane %v359_v41, 4  ;;  %v346_v52 = vrot.slane %v345_v42, 4  ;;  %v353_v55 = vrot.slane %v352_v43, 4 }
 0x18f   :  { %v301_v53 = vmax.f32 %v289_v49, 0.0  ;;  %v291_v54 = vpop.f32.mrb[2].mxu1  ;;  %v380_v56 = vsel %vm344_vm10, %v657_v46, -inf  ;;  %v368_v59 = vmax.f32 %v366_v40, %v367_v50  ;;  %v387_v13 = vsel %vm344_vm10, %v315_v45, -inf }
 0x190   :  { %v302_v57 = vmax.f32 %v291_v54, 0.0  ;;  %v293_v58 = vpop.f32.mrb[3].mxu1  ;;  %v361_v60 = vmax.f32 %v359_v41, %v360_v51  ;;  %v347_v61 = vmax.f32 %v345_v42, %v346_v52  ;;  %v354_v8 = vmax.f32 %v352_v43, %v353_v55 }
 0x191   :  { %v316_v62 = vcombine.low %v300_v48, %v301_v53  ;;  %v317_v63 = vcombine.high %v300_v48, %v301_v53  ;;  %v659_v0 = vcombine.low %v301_v53, %v301_v53  ;;  %v660_v1 = vcombine.high %v301_v53, %v301_v53 }
 0x192   :  { %v916_v2 = vmax.f32 %v293_v58, 0.0  ;;  %v369_v3 = vrot.slane %v368_v59, 2  ;;  %v362_v4 = vrot.slane %v361_v60, 2  ;;  %v348_v6 = vrot.slane %v347_v61, 2 }
 0x193   :  { %v408_v7 = vsel %vm344_vm10, %v659_v0, -inf  ;;  %v422_v9 = vsel %vm344_vm10, %v660_v1, -inf  ;;  %v401_v10 = vsel %vm344_vm10, %v316_v62, -inf  ;;  %v355_v18 = vrot.slane %v354_v8, 2 }
 0x194   :  { %v318_v11 = vcombine.low %v302_v57, %v916_v2  ;;  %v319_v12 = vcombine.high %v302_v57, %v916_v2  ;;  %v370_v14 = vmax.f32 %v368_v59, %v369_v3  ;;  %v363_v15 = vmax.f32 %v361_v60, %v362_v4 }
 0x195   :  { %v349_v16 = vmax.f32 %v347_v61, %v348_v6  ;;  %v409_v17 = vrot.slane %v408_v7, 4  ;;  %v423_v19 = vrot.slane %v422_v9, 4  ;;  %v402_v20 = vrot.slane %v401_v10, 4 }
 0x196   :  { %v381_v21 = vrot.slane %v380_v56, 4  ;;  %v371_v22 = vrot.slane %v370_v14, 1  ;;  %v364_v23 = vrot.slane %v363_v15, 1  ;;  %v356_v26 = vmax.f32 %v354_v8, %v355_v18 }
 0x197   :  { %v350_v24 = vrot.slane %v349_v16, 1  ;;  %v410_v25 = vmax.f32 %v408_v7, %v409_v17  ;;  %v424_v27 = vmax.f32 %v422_v9, %v423_v19  ;;  %v403_v28 = vmax.f32 %v401_v10, %v402_v20 }
 0x198   :  { %v382_v29 = vmax.f32 %v380_v56, %v381_v21  ;;  %v658_v30 = vcombine.high %v905_v39, %v905_v39  ;;  %v926_v31 = vmax.f32 %v370_v14, %v371_v22  ;;  %v928_v32 = vmax.f32 %v363_v15, %v364_v23 }
 0x199   :  { %v411_v33 = vrot.slane %v410_v25, 2  ;;  %v930_v34 = vmax.f32 %v349_v16, %v350_v24  ;;  %v425_v35 = vrot.slane %v424_v27, 2  ;;  %v404_v36 = vrot.slane %v403_v28, 2 }
 0x19a   :  { %v383_v37 = vrot.slane %v382_v29, 2  ;;  %507 = vrot.lane.b32.xlu1 %v926_v31, %s822_s16  ;;  %467 = vrot.lane.b32.xlu0 %v928_v32, %s822_s16  ;;  %v415_v40 = vsel %vm344_vm10, %v317_v63, -inf  ;;  %v388_v39 = vrot.slane %v387_v13, 4  ;;  %v373_v41 = vsel %vm344_vm10, %v314_v44, -inf }
 0x19b   :  { %v412_v38 = vmax.f32 %v410_v25, %v411_v33  ;;  %v357_v42 = vrot.slane %v356_v26, 1  ;;  %v426_v43 = vmax.f32 %v424_v27, %v425_v35  ;;  %v405_v45 = vmax.f32 %v403_v28, %v404_v36 }
 0x19c   :  { %v384_v46 = vmax.f32 %v382_v29, %v383_v37  ;;  %v416_v48 = vrot.slane %v415_v40, 4  ;;  %v389_v49 = vmax.f32 %v387_v13, %v388_v39  ;;  %v374_v50 = vrot.slane %v373_v41, 4 }
 0x19d   :  { %v413_v47 = vrot.slane %v412_v38, 1  ;;  %v661_v51 = vcombine.low %v916_v2, %v916_v2  ;;  %v427_v52 = vrot.slane %v426_v43, 1  ;;  %v394_v53 = vsel %vm344_vm10, %v658_v30, -inf }
 0x19e   :  { %465 = vrot.lane.b32.xlu0 %v930_v34, %s822_s16  ;;  %v417_v44 = vmax.f32 %v415_v40, %v416_v48  ;;  %v390_v55 = vrot.slane %v389_v49, 2  ;;  %v375_v56 = vmax.f32 %v373_v41, %v374_v50  ;;  %v662_v57 = vcombine.high %v916_v2, %v916_v2 }
 0x19f   :  { %v943_v54 = vmax.f32 %v412_v38, %v413_v47  ;;  %v947_v58 = vmax.f32 %v356_v26, %v357_v42  ;;  %v406_v59 = vrot.slane %v405_v45, 1  ;;  %v395_v60 = vrot.slane %v394_v53, 4 }
 0x1a0   :  { %v385_v61 = vrot.slane %v384_v46, 1  ;;  %v418_v62 = vrot.slane %v417_v44, 2  ;;  %v376_v63 = vrot.slane %v375_v56, 2  ;;  %v429_v0 = vsel %vm344_vm10, %v318_v11, -inf }
 0x1a1   :  { %513 = vrot.lane.b32.xlu1 %v943_v54, %s822_s16  ;;  %v396_v1 = vmax.f32 %v394_v53, %v395_v60  ;;  %v430_v3 = vrot.slane %v429_v0, 4  ;;  %v436_v4 = vsel %vm344_vm10, %v661_v51, -inf  ;;  %v443_v6 = vsel %vm344_vm10, %v319_v12, -inf }
 0x1a2   :  { %505 = vrot.lane.b32.xlu0 %v947_v58, %s822_s16  ;;  %v956_v2 = vmax.f32 %v426_v43, %v427_v52  ;;  %v419_v7 = vmax.f32 %v417_v44, %v418_v62  ;;  %v391_v8 = vmax.f32 %v389_v49, %v390_v55  ;;  %v437_v9 = vrot.slane %v436_v4, 4  ;;  %v545_v52 = vld [vmem:[%s1073_s3] sm:$0xff] }
 0x1a3   :  { %v397_v10 = vrot.slane %v396_v1, 2  ;;  %v431_v13 = vmax.f32 %v429_v0, %v430_v3  ;;  %v444_v14 = vrot.slane %v443_v6, 4  ;;  %v450_v15 = vsel %vm344_vm10, %v662_v57, -inf }
 0x1a4   :  { %v961_v11 = vmax.f32 %v405_v45, %v406_v59  ;;  %v420_v16 = vrot.slane %v419_v7, 1  ;;  %v377_v12 = vmax.f32 %v375_v56, %v376_v63  ;;  %v438_v17 = vmax.f32 %v436_v4, %v437_v9 }
 0x1a5   :  { %515 = vrot.lane.b32.xlu1 %v956_v2, %s822_s16  ;;  %v432_v18 = vrot.slane %v431_v13, 2  ;;  %v445_v19 = vmax.f32 %v443_v6, %v444_v14  ;;  %v451_v20 = vrot.slane %v450_v15, 4  ;;  %v965_v21 = vmax.f32 %v384_v46, %v385_v61 }
 0x1a6   :  { %473 = vrot.lane.b32.xlu0 %v961_v11, %s822_s16  ;;  %v392_v22 = vrot.slane %v391_v8, 1  ;;  %v398_v23 = vmax.f32 %v396_v1, %v397_v10  ;;  %v439_v24 = vrot.slane %v438_v17, 2  ;;  %v421_v26 = vmax.f32 %v419_v7, %v420_v16 }
 0x1a7   :  { %v452_v25 = vmax.f32 %v450_v15, %v451_v20  ;;  %v378_v27 = vrot.slane %v377_v12, 1  ;;  %v433_v28 = vmax.f32 %v431_v13, %v432_v18  ;;  %v446_v29 = vrot.slane %v445_v19, 2 }
 0x1a8   :  { %v970_v30 = vmax.f32 %v391_v8, %v392_v22  ;;  %v399_v33 = vrot.slane %v398_v23, 1  ;;  %v440_v35 = vmax.f32 %v438_v17, %v439_v24  ;;  %v999_v55 = vmul.f32 0.6, %v545_v52 }
 0x1a9   :  { %509 = vrot.lane.b32.xlu1 %v965_v21, %s822_s16  ;;  %v453_v36 = vrot.slane %v452_v25, 2  ;;  %v379_v37 = vmax.f32 %v377_v12, %v378_v27  ;;  %v434_v38 = vrot.slane %v433_v28, 1  ;;  %v447_v40 = vmax.f32 %v445_v19, %v446_v29 }
 0x1aa   :  { %475 = vrot.lane.b32.xlu0 %v421_v26, %s822_s16  ;;  %v975_v39 = vmax.f32 %v398_v23, %v399_v33  ;;  %v441_v41 = vrot.slane %v440_v35, 1  ;;  %v548_v60 = vrot.slane %v999_v55, 1  ;;  %v551_v7 = vrot.slane %v999_v55, 4 }
 0x1ab   :  { %v454_v42 = vmax.f32 %v452_v25, %v453_v36  ;;  %v979_v43 = vmax.f32 %v433_v28, %v434_v38  ;;  %v448_v45 = vrot.slane %v447_v40, 1  ;;  %v1011_v8 = vstv %s1070_s0  ;;  %s823_s0 = smov [#allocation9]  }
 0x1ac   :  { %v983_v46 = vmax.f32 %v440_v35, %v441_v41  ;;  %v552_v15 = vrot.slane %v999_v55, 5  ;;  %v549_v18 = vrot.slane %v999_v55, 2  ;;  %s633_s20 = sshll.u32 %s823_s0, 4  ;;  %vm623_vm10 = vcmask 1047559   ;;  %s634_s20 = int_to_ptr.vmem [resolvable:$true] %s633_s20 }
 0x1ad   :  { %471 = vrot.lane.b32.xlu1 %v970_v30, %s822_s16  ;;  %v455_v47 = vrot.slane %v454_v42, 1  ;;  %v987_v48 = vmax.f32 %v447_v40, %v448_v45  ;;  %s784_s21 = scalar_lea.vmem %s634_s20, 128  ;;  %p789_p3 = scmp.lt.s32.totalorder %s634_s20, %s634_s20 }
 0x1ae   :  { %469 = vrot.lane.b32.xlu0 %v379_v37, %s822_s16  ;;  %p785_p2 = scmp.ne.s32.totalorder %s634_s20, %s784_s21  ;;  %p790_p4 = scmp.lt.s32.totalorder %s784_s21, %s784_s21 }
 0x1af   :  { %v991_v49 = vmax.f32 %v454_v42, %v455_v47  ;;  %v554_v47 = vrot.slane %v999_v55, 7 }
 0x1b0   :  { %p791_p5 = por %p790_p4, %p789_p3 }
 0x1b1   :  { %511 = vrot.lane.b32.xlu1 %v975_v39, %s822_s16 }
 0x1b2   :  { %477 = vrot.lane.b32.xlu0 %v979_v43, %s822_s16  ;;  %p792_p6 = pnand %p791_p5, %p785_p2 }
 0x1b5   :  { %517 = vrot.lane.b32.xlu1 %v983_v46, %s822_s16 }
 0x1b6   :  { %479 = vrot.lane.b32.xlu0 %v987_v48, %s822_s16 }
 0x1b9   :  { %519 = vrot.lane.b32.xlu1 %v991_v49, %s822_s16 }
 0x20c   :  { %v468_v50 = vpop.permute.xlu0 %467  ;;  %v508_v51 = vpop.permute.xlu1 %507 }
 0x20d   :  { %v530_v44 = vmax.f32 %v926_v31, %v508_v51  ;;  %v490_v56 = vmax.f32 %v928_v32, %v468_v50 }
 0x20f   :  { %v538_v61 = vmax.f32 %v490_v56, %v530_v44 }
 0x210   :  { %v466_v53 = vpop.permute.xlu0 %465 }
 0x211   :  { %v489_v0 = vmax.f32 %v930_v34, %v466_v53  ;;  %v564_v31 = vadd.f32 %v548_v60, %v538_v61 }
 0x213   :  { %v514_v57 = vpop.permute.xlu1 %513  ;;  %v573_v13 = vsub.f32 %v564_v31, %v1011_v8 }
 0x214   :  { %v506_v59 = vpop.permute.xlu0 %505  ;;  %v533_v3 = vmax.f32 %v943_v54, %v514_v57 }
 0x215   :  { %v529_v62 = vmax.f32 %v947_v58, %v506_v59  ;;  %vm581_vm11 = vcmp.ge.f32.partialorder %v573_v13, 0.0 }
 0x217   :  { %v516_v63 = vpop.permute.xlu1 %515  ;;  %v537_v6 = vmax.f32 %v489_v0, %v529_v62 }
 0x218   :  { %v474_v1 = vpop.permute.xlu0 %473  ;;  %v534_v10 = vmax.f32 %v956_v2, %v516_v63 }
 0x219   :  { %v493_v4 = vmax.f32 %v961_v11, %v474_v1  ;;  %v563_v54 = vadd.f32 %v999_v55, %v537_v6 }
 0x21b   :  { %v510_v32 = vpop.permute.xlu1 %509  ;;  %v541_v9 = vmax.f32 %v493_v4, %v533_v3  ;;  %v572_v20 = vsub.f32 %v563_v54, %v1011_v8 }
 0x21c   :  { %v476_v58 = vpop.permute.xlu0 %475  ;;  %v531_v17 = vmax.f32 %v965_v21, %v510_v32  ;;  %v589_v21 = vsel %vm581_vm11, 1.0, %v817_v5 }
 0x21d   :  { %v494_v34 = vmax.f32 %v421_v26, %v476_v58  ;;  %v567_v14 = vadd.f32 %v551_v7, %v541_v9  ;;  %v550_v26 = vrot.slane %v999_v55, 3  ;;  %vm580_vm12 = vcmp.ge.f32.partialorder %v572_v20, 0.0 }
 0x21e   :  { %v604_v42 = vrot.slane %v589_v21, 7  ;;  %v588_v50 = vsel %vm580_vm12, 1.0, %v817_v5 }
 0x21f   :  { %v472_v11 = vpop.permute.xlu1 %471  ;;  %v542_v16 = vmax.f32 %v494_v34, %v534_v10  ;;  %v576_v2 = vsub.f32 %v567_v14, %v1011_v8 }
 0x220   :  { %v470_v12 = vpop.permute.xlu0 %469  ;;  %v492_v24 = vmax.f32 %v970_v30, %v472_v11  ;;  %v606_v61 = vsel %vm605_vm14, %v604_v42, %v588_v50 }
 0x221   :  { %v491_v19 = vmax.f32 %v379_v37, %v470_v12  ;;  %v568_v22 = vadd.f32 %v552_v15, %v542_v16  ;;  %vm1025_vm13 = vcmp.ge.f32.partialorder %v576_v2, 0.0  ;;  %v553_v37 = vrot.slane %v999_v55, 6 }
 0x222   :  { %v592_v53 = vsel %vm1025_vm13, 1.0, %v817_v5 }
 0x223   :  { %v512_v23 = vpop.permute.xlu1 %511  ;;  %v539_v25 = vmax.f32 %v491_v19, %v531_v17  ;;  %v577_v36 = vsub.f32 %v568_v22, %v1011_v8  ;;  %v613_v1 = vrot.slane %v592_v53, 4 }
 0x224   :  { %v532_v27 = vmax.f32 %v975_v39, %v512_v23  ;;  %v478_v28 = vpop.permute.xlu0 %477 }
 0x225   :  { %v565_v29 = vadd.f32 %v549_v18, %v539_v25  ;;  %v495_v39 = vmax.f32 %v979_v43, %v478_v28  ;;  %vm1040_vm1 = vcmp.ge.f32.partialorder %v577_v36, 0.0 }
 0x226   :  { %v540_v33 = vmax.f32 %v492_v24, %v532_v27 }
 0x227   :  { %v518_v30 = vpop.permute.xlu1 %517  ;;  %v574_v38 = vsub.f32 %v565_v29, %v1011_v8 }
 0x228   :  { %v566_v40 = vadd.f32 %v550_v26, %v540_v33  ;;  %v535_v41 = vmax.f32 %v983_v46, %v518_v30  ;;  %v480_v45 = vpop.permute.xlu0 %479 }
 0x229   :  { %vm582_vm0 = vcmp.ge.f32.partialorder %v574_v38, 0.0  ;;  %v496_v44 = vmax.f32 %v987_v48, %v480_v45  ;;  %v593_v48 = vsel %vm1040_vm1, 1.0, %v817_v5 }
 0x22a   :  { %v575_v51 = vsub.f32 %v566_v40, %v1011_v8  ;;  %v543_v52 = vmax.f32 %v495_v39, %v535_v41  ;;  %v590_v46 = vsel %vm582_vm0, 1.0, %v817_v5  ;;  %v616_v7 = vrot.slane %v593_v48, 3 }
 0x22b   :  { %v520_v56 = vpop.permute.xlu1 %519  ;;  %v607_v55 = vrot.slane %v590_v46, 6 }
 0x22c   :  { %vm583_vm2 = vcmp.ge.f32.partialorder %v575_v51, 0.0  ;;  %v569_v57 = vadd.f32 %v553_v37, %v543_v52  ;;  %v536_v59 = vmax.f32 %v991_v49, %v520_v56 }
 0x22d   :  { %v591_v60 = vsel %vm583_vm2, 1.0, %v817_v5  ;;  %v609_v3 = vsel %vm608_vm15, %v607_v55, %v606_v61 }
 0x22e   :  { %v610_v62 = vrot.slane %v591_v60, 5  ;;  %v578_v63 = vsub.f32 %v569_v57, %v1011_v8  ;;  %v544_v0 = vmax.f32 %v496_v44, %v536_v59 }
 0x230   :  { %v612_v4 = vsel %vm611_vm3, %v610_v62, %v609_v3  ;;  %vm586_vm5 = vcmp.ge.f32.partialorder %v578_v63, 0.0  ;;  %v570_v49 = vadd.f32 %v554_v47, %v544_v0 }
 0x231   :  { %v594_v31 = vsel %vm586_vm5, 1.0, %v817_v5  ;;  %v615_v6 = vsel %vm614_vm4, %v613_v1, %v612_v4 }
 0x232   :  { %v579_v32 = vsub.f32 %v570_v49, %v1011_v8  ;;  %v619_v9 = vrot.slane %v594_v31, 2  ;;  %v618_v58 = vsel %vm617_vm6, %v616_v7, %v615_v6 }
 0x234   :  { %vm587_vm7 = vcmp.ge.f32.partialorder %v579_v32, 0.0  ;;  %v621_v13 = vsel %vm620_vm9, %v619_v9, %v618_v58 }
 0x235   :  { %v595_v10 = vsel %vm587_vm7, 1.0, %v817_v5 }
 0x236   :  { %v622_v34 = vrot.slane %v595_v10, 1 }
 0x238   :  { %v624_v54 = vsel %vm623_vm10, %v622_v34, %v621_v13 }
 0x239   :  { %626 = vst.msk [vmem:[#allocation9] sm:$0xff] %vm169_vm8, %v624_v54 }
 0x23a   :  { %795 = shalt.err (!%p792_p6)
}
 0x23b   :  { %s796_s24 = scalar_lea.hbm %s1074_s4, 128 }
 0x23c   :  { %p797_p7 = scmp.ne.s32.totalorder %s1074_s4, %s796_s24  ;;  %p800_p8 = scmp.lt.u32.totalorder %s796_s24, %s1074_s4 }
 0x23e   :  { %p802_p9 = pnand %p800_p8, %p797_p7 }
 0x240   :  { %805 = shalt.err (!%p802_p9)
}
 0x241   :  { %636 = dma.vmem_to_hbm [thread:$0]  %s634_s20, 128, %s1074_s4, [#allocation6]  }
 0x242   :  { %810 = dma.done.wait [#allocation6], 128  }
 0x243   :  { %811 = vsyncadd [#allocation6], 4294967168 }
 0x244   :  { %640 = vsyncpa [#allocation5], 1 }
 0x245   :  { %641 = vsyncpa [#allocation8], 1 }
 0x246   :  { %642 = vsyncpa [#allocation6], 1 }

</bundles_post_ra>
